<compile_context>
chip_gen: v7x
topology: tpu7x:2x2x1
jax: 0.10.0
libtpu: 0.0.40
codegen_flags: <defaults>
</compile_context>

<pallas_src>
import math
import functools

import jax
import jax.numpy as jnp
from jax import lax
from jax.experimental import pallas as pl
from jax.experimental.pallas import tpu as pltpu


def _performer_kernel(x_ref, wk_ref, wq_ref, wv_ref, bk_ref, bq_ref, bv_ref,
                      wrf_ref, wproj_ref, bproj_ref, o_ref, *, m, m_pad, eps):
    Bb, T, dim = x_ref.shape
    emb = wproj_ref.shape[1]
    rows = Bb * T

    # ---- k/q/v projections on the flattened (Bb*T, dim) operand ------------
    x = x_ref[...].reshape(rows, dim)
    xb = x.astype(jnp.bfloat16)

    def proj(w_r, b_r):
        return (jnp.dot(xb, w_r[...], preferred_element_type=jnp.float32)
                + b_r[...])                                     # (rows, emb) f32

    k = proj(wk_ref, bk_ref)
    q = proj(wq_ref, bq_ref)
    v = proj(wv_ref, bv_ref)

    # ---- Performer random-feature maps (f32 exp, bf16 matmul) --------------
    inv_sqrt_m = 1.0 / math.sqrt(m)
    if m_pad != m:
        col = lax.broadcasted_iota(jnp.int32, (1, m_pad), 1)
        feat_mask = (col < m).astype(jnp.float32)               # (1, m_pad)
    else:
        feat_mask = None

    def prm_exp(z):                                             # z: (rows, emb) f32
        zd = jnp.sum(z * z, axis=-1, keepdims=True) * 0.5       # (rows, 1) f32
        wtz = jnp.dot(z.astype(jnp.bfloat16), wrf_ref[...],
                      preferred_element_type=jnp.float32)       # (rows, m_pad)
        phi = jnp.exp(wtz - zd) * inv_sqrt_m                    # f32 exp
        if feat_mask is not None:
            phi = phi * feat_mask                               # zero padded features
        return phi

    kp = prm_exp(k).reshape(Bb, T, m_pad)
    qp = prm_exp(q).reshape(Bb, T, m_pad)
    vb = v.reshape(Bb, T, emb)

    # ---- D_t = qp_t . sum_i kp_i  (VPU reduce instead of N=1 matmul) -------
    kp_sum = jnp.sum(kp, axis=1, keepdims=True)                 # (Bb, 1, m_pad)
    D = jnp.sum(qp * kp_sum, axis=-1, keepdims=True)            # (Bb, T, 1)

    # ---- kptv_{b,n,m} = sum_t v_{b,t,n} kp_{b,t,m}  (no v.T materialized) --
    kptv = lax.dot_general(vb.astype(jnp.bfloat16), kp.astype(jnp.bfloat16),
                           dimension_numbers=(((1,), (1,)), ((0,), (0,))),
                           preferred_element_type=jnp.float32)  # (Bb, emb, m_pad)

    # ---- y_{b,t,n} = (qp_t . kptv_n) * 1/(D_t + eps) ------------------------
    y = lax.dot_general(qp.astype(jnp.bfloat16), kptv.astype(jnp.bfloat16),
                        dimension_numbers=(((2,), (2,)), ((0,), (0,))),
                        preferred_element_type=jnp.float32)     # (Bb, T, emb)
    inv_d = pl.reciprocal(D + eps, approx=True)                 # one recip per row
    y = (y * inv_d).reshape(rows, emb)

    # ---- output projection (dropout p=0 -> identity) ------------------------
    out = (jnp.dot(y.astype(jnp.bfloat16), wproj_ref[...],
                   preferred_element_type=jnp.float32) + bproj_ref[...])
    o_ref[...] = out.reshape(Bb, T, emb).astype(o_ref.dtype)


def _pick_batch_block(B, T, target_rows):
    """Pack enough batch elements per grid step to give the MXU a big M."""
    want = max(1, -(-target_rows // max(T, 1)))      # ceil(target_rows / T)
    bb = min(B, want)
    while B % bb:
        bb -= 1
    # Keep >= 2 grid steps (v7x has 2 TensorCores) when that doesn't shrink
    # the per-step matmul M below the target.
    if B // bb < 2 and bb % 2 == 0 and (bb // 2) * T >= target_rows:
        bb //= 2
    return bb


def _vmem_limit_bytes(Bb, T, dim, emb, m_pad):
    f32, bf16 = 4, 2
    rows = Bb * T
    io = 2 * rows * dim * f32 + 2 * rows * emb * f32                 # x / out (dbl-buffered)
    wts = 2 * ((3 * dim * emb + emb * m_pad + emb * emb) * bf16
               + 4 * emb * f32)                                      # resident weights / biases
    inter = (rows * (3 * emb + 2 * m_pad + emb) * f32                # k,q,v,kp,qp,y
             + Bb * emb * m_pad * f32                                # kptv
             + rows * (dim + 3 * emb + 2 * m_pad + emb) * bf16)      # bf16 operand copies
    est = io + wts + inter
    # 4x headroom for compiler temporaries; cap at v7x's 64 MiB physical VMEM.
    # TODO(synk): for very long sequences, tile T with a two-pass kernel
    # (accumulate kp_sum / kptv, then stream y) instead of raising this limit.
    return int(min(64 * 1024 * 1024, max(32 * 1024 * 1024, 4 * est)))


def attention_performer(x, wkqv, bkqv, w, wproj, bproj, *, eps=1e-8,
                        target_rows=256):
    # target_rows: per-grid-step matmul M.  256 suits v6e/v7x (2x256^2 MXU);
    # pass 128 on v5e (4x128^2 MXU).
    B, T, dim = x.shape
    emb = wproj.shape[0]
    m = w.shape[0]
    m_pad = -(-m // 128) * 128                        # lane-dense feature dim

    # One-time weight prep outside the kernel: split kqv into k/q/v blocks,
    # transpose everything to (in, out), pad the random-feature matrix, bf16.
    wk = wkqv[0 * emb:1 * emb].T.astype(jnp.bfloat16)            # (dim, emb)
    wq = wkqv[1 * emb:2 * emb].T.astype(jnp.bfloat16)
    wv = wkqv[2 * emb:3 * emb].T.astype(jnp.bfloat16)
    bk = bkqv[:, 0 * emb:1 * emb]                                # (1, emb) f32
    bq = bkqv[:, 1 * emb:2 * emb]
    bv = bkqv[:, 2 * emb:3 * emb]
    wrf = jnp.pad(w, ((0, m_pad - m), (0, 0))).T.astype(jnp.bfloat16)  # (emb, m_pad)
    wpj = wproj.T.astype(jnp.bfloat16)                           # (emb, emb)

    Bb = _pick_batch_block(B, T, target_rows)
    grid = (B // Bb,)

    kernel = functools.partial(_performer_kernel, m=m, m_pad=m_pad, eps=eps)

    return pl.pallas_call(
        kernel,
        out_shape=jax.ShapeDtypeStruct((B, T, emb), jnp.float32),
        grid_spec=pltpu.PrefetchScalarGridSpec(
            num_scalar_prefetch=0,
            grid=grid,
            in_specs=[
                pl.BlockSpec((Bb, T, dim), lambda b: (b, 0, 0)),     # x
                pl.BlockSpec((dim, emb), lambda b: (0, 0)),          # Wk
                pl.BlockSpec((dim, emb), lambda b: (0, 0)),          # Wq
                pl.BlockSpec((dim, emb), lambda b: (0, 0)),          # Wv
                pl.BlockSpec((1, emb), lambda b: (0, 0)),            # bk
                pl.BlockSpec((1, emb), lambda b: (0, 0)),            # bq
                pl.BlockSpec((1, emb), lambda b: (0, 0)),            # bv
                pl.BlockSpec((emb, m_pad), lambda b: (0, 0)),        # random features
                pl.BlockSpec((emb, emb), lambda b: (0, 0)),          # Wproj
                pl.BlockSpec((1, emb), lambda b: (0, 0)),            # bproj
            ],
            out_specs=pl.BlockSpec((Bb, T, emb), lambda b: (b, 0, 0)),
        ),
        compiler_params=pltpu.CompilerParams(
            dimension_semantics=("parallel",),
            vmem_limit_bytes=_vmem_limit_bytes(Bb, T, dim, emb, m_pad)),
    )(x, wk, wq, wv, bk, bq, bv, wrf, wpj, bproj)


def reference(x, wkqv, bkqv, w, wproj, bproj, *, eps=1e-8):
    """Pure-JAX f32 reference mirroring the PyTorch module."""
    emb = wproj.shape[0]
    m = w.shape[0]
    kqv = x @ wkqv.T + bkqv[0]
    k, q, v = kqv[..., :emb], kqv[..., emb:2 * emb], kqv[..., 2 * emb:]

    def prm_exp(z):
        zd = jnp.sum(z * z, axis=-1, keepdims=True) / 2.0
        wtz = jnp.einsum('bti,mi->btm', z, w)
        return jnp.exp(wtz - zd) / math.sqrt(m)

    kp, qp = prm_exp(k), prm_exp(q)
    D = jnp.einsum('bti,bi->bt', qp, kp.sum(axis=1))[..., None]
    kptv = jnp.einsum('bin,bim->bnm', v, kp)
    y = jnp.einsum('bti,bni->btn', qp, kptv) / (D + eps)
    return y @ wproj.T + bproj[0]


if __name__ == "__main__":
    # Small shapes consistent with the module: dim=32, num_heads=1 -> emb=32,
    # kernel_ratio=0.5 -> m=16, batch=2, seq=8.
    B, T, dim = 2, 8, 32
    num_heads = 1
    emb = dim * num_heads
    kernel_ratio = 0.5
    m = int(emb * kernel_ratio)

    key = jax.random.PRNGKey(0)
    kx, kw1, kb1, kw2, kb2, korth = jax.random.split(key, 6)

    x = jax.random.normal(kx, (B, T, dim), dtype=jnp.float32)

    # kqv Linear(dim, 3*emb): weight (3*emb, dim), bias stored as (1, 3*emb)
    wkqv = jax.random.normal(kw1, (3 * emb, dim), dtype=jnp.float32) * 0.05
    bkqv = jax.random.normal(kb1, (1, 3 * emb), dtype=jnp.float32) * 0.01

    # proj Linear(emb, emb)
    wproj = jax.random.normal(kw2, (emb, emb), dtype=jnp.float32) * 0.05
    bproj = jax.random.normal(kb2, (1, emb), dtype=jnp.float32) * 0.01

    # Random-feature matrix w: orthogonal rows (m, emb) scaled by sqrt(m),
    # matching nn.init.orthogonal_(randn(m, emb)) * sqrt(m) semantics.
    g = jax.random.normal(korth, (emb, m), dtype=jnp.float32)
    qmat, _ = jnp.linalg.qr(g)            # (emb, m), orthonormal columns
    w = qmat.T * math.sqrt(m)             # (m, emb), orthonormal rows scaled

    out = attention_performer(x, wkqv, bkqv, w, wproj, bproj)
    out = jax.block_until_ready(out)

    ref = reference(x, wkqv, bkqv, w, wproj, bproj)
    assert out.shape == (B, T, emb)
    # bf16 matmul operands + approx reciprocal -> mixed-precision tolerance.
    assert jnp.allclose(out, ref, atol=2e-2, rtol=2e-2), "mismatch vs reference"

    print("KERNEL_OK")
</pallas_src>

<mosaic_0001>
module attributes {stable_mosaic.version = 11 : i64} {
  func.func @_performer_kernel(%arg0: i32, %arg1: memref<2x8x32xf32, #tpu.memory_space<vmem>>, %arg2: memref<32x32xbf16, #tpu.memory_space<vmem>>, %arg3: memref<32x32xbf16, #tpu.memory_space<vmem>>, %arg4: memref<32x32xbf16, #tpu.memory_space<vmem>>, %arg5: memref<1x32xf32, #tpu.memory_space<vmem>>, %arg6: memref<1x32xf32, #tpu.memory_space<vmem>>, %arg7: memref<1x32xf32, #tpu.memory_space<vmem>>, %arg8: memref<32x128xbf16, #tpu.memory_space<vmem>>, %arg9: memref<32x32xbf16, #tpu.memory_space<vmem>>, %arg10: memref<1x32xf32, #tpu.memory_space<vmem>>, %arg11: memref<2x8x32xf32, #tpu.memory_space<vmem>>) attributes {dimension_semantics = [#tpu.dimension_semantics<parallel>], iteration_bounds = array<i64: 1>, scalar_prefetch = 0 : i64, scratch_operands = 0 : i64, tpu.core_type = #tpu.core_type<tc>, window_params = [{transform_indices = @transform_0, window_bounds = array<i64: 2, 8, 32>}, {pipeline_mode = #tpu.pipeline_mode<synchronous>, transform_indices = @transform_1, window_bounds = array<i64: 32, 32>}, {pipeline_mode = #tpu.pipeline_mode<synchronous>, transform_indices = @transform_2, window_bounds = array<i64: 32, 32>}, {pipeline_mode = #tpu.pipeline_mode<synchronous>, transform_indices = @transform_3, window_bounds = array<i64: 32, 32>}, {pipeline_mode = #tpu.pipeline_mode<synchronous>, transform_indices = @transform_4, window_bounds = array<i64: 1, 32>}, {pipeline_mode = #tpu.pipeline_mode<synchronous>, transform_indices = @transform_5, window_bounds = array<i64: 1, 32>}, {pipeline_mode = #tpu.pipeline_mode<synchronous>, transform_indices = @transform_6, window_bounds = array<i64: 1, 32>}, {pipeline_mode = #tpu.pipeline_mode<synchronous>, transform_indices = @transform_7, window_bounds = array<i64: 32, 128>}, {pipeline_mode = #tpu.pipeline_mode<synchronous>, transform_indices = @transform_8, window_bounds = array<i64: 32, 32>}, {pipeline_mode = #tpu.pipeline_mode<synchronous>, transform_indices = @transform_9, window_bounds = array<i64: 1, 32>}, {transform_indices = @transform_10, window_bounds = array<i64: 2, 8, 32>}]} {
    %c0 = arith.constant 0 : index
    %c0_0 = arith.constant 0 : index
    %c0_1 = arith.constant 0 : index
    %0 = vector.load %arg1[%c0, %c0_0, %c0_1] : memref<2x8x32xf32, #tpu.memory_space<vmem>>, vector<2x8x32xf32>
    %1 = vector.shape_cast %0 : vector<2x8x32xf32> to vector<16x32xf32>
    %2 = arith.truncf %1 : vector<16x32xf32> to vector<16x32xbf16>
    %c0_2 = arith.constant 0 : index
    %c0_3 = arith.constant 0 : index
    %3 = vector.load %arg2[%c0_2, %c0_3] : memref<32x32xbf16, #tpu.memory_space<vmem>>, vector<32x32xbf16>
    %cst = arith.constant dense<0.000000e+00> : vector<16x32xf32>
    %4 = tpu.matmul %2, %3, %cst {dimension_numbers = #tpu.dot_dimension_numbers<[1], [0], [0], [1], [0, 0, 1, 1], [], []>} : vector<16x32xbf16>, vector<32x32xbf16>, vector<16x32xf32> -> vector<16x32xf32>
    %c0_4 = arith.constant 0 : index
    %c0_5 = arith.constant 0 : index
    %5 = vector.load %arg5[%c0_4, %c0_5] : memref<1x32xf32, #tpu.memory_space<vmem>>, vector<1x32xf32>
    %6 = vector.broadcast %5 : vector<1x32xf32> to vector<16x32xf32>
    %7 = arith.addf %4, %6 : vector<16x32xf32>
    %c0_6 = arith.constant 0 : index
    %c0_7 = arith.constant 0 : index
    %8 = vector.load %arg3[%c0_6, %c0_7] : memref<32x32xbf16, #tpu.memory_space<vmem>>, vector<32x32xbf16>
    %cst_8 = arith.constant dense<0.000000e+00> : vector<16x32xf32>
    %9 = tpu.matmul %2, %8, %cst_8 {dimension_numbers = #tpu.dot_dimension_numbers<[1], [0], [0], [1], [0, 0, 1, 1], [], []>} : vector<16x32xbf16>, vector<32x32xbf16>, vector<16x32xf32> -> vector<16x32xf32>
    %c0_9 = arith.constant 0 : index
    %c0_10 = arith.constant 0 : index
    %10 = vector.load %arg6[%c0_9, %c0_10] : memref<1x32xf32, #tpu.memory_space<vmem>>, vector<1x32xf32>
    %11 = vector.broadcast %10 : vector<1x32xf32> to vector<16x32xf32>
    %12 = arith.addf %9, %11 : vector<16x32xf32>
    %c0_11 = arith.constant 0 : index
    %c0_12 = arith.constant 0 : index
    %13 = vector.load %arg4[%c0_11, %c0_12] : memref<32x32xbf16, #tpu.memory_space<vmem>>, vector<32x32xbf16>
    %cst_13 = arith.constant dense<0.000000e+00> : vector<16x32xf32>
    %14 = tpu.matmul %2, %13, %cst_13 {dimension_numbers = #tpu.dot_dimension_numbers<[1], [0], [0], [1], [0, 0, 1, 1], [], []>} : vector<16x32xbf16>, vector<32x32xbf16>, vector<16x32xf32> -> vector<16x32xf32>
    %c0_14 = arith.constant 0 : index
    %c0_15 = arith.constant 0 : index
    %15 = vector.load %arg7[%c0_14, %c0_15] : memref<1x32xf32, #tpu.memory_space<vmem>>, vector<1x32xf32>
    %16 = vector.broadcast %15 : vector<1x32xf32> to vector<16x32xf32>
    %17 = arith.addf %14, %16 : vector<16x32xf32>
    %18 = tpu.iota {dimensions = array<i32: 1>} : vector<1x128xi32>
    %c16_i32 = arith.constant 16 : i32
    %19 = vector.broadcast %c16_i32 : i32 to vector<1x128xi32>
    %20 = arith.cmpi slt, %18, %19 : vector<1x128xi32>
    %21 = arith.extui %20 : vector<1x128xi1> to vector<1x128xi32>
    %22 = arith.sitofp %21 : vector<1x128xi32> to vector<1x128xf32>
    %23 = arith.mulf %7, %7 : vector<16x32xf32>
    %cst_16 = arith.constant dense<0.000000e+00> : vector<16xf32>
    %24 = vector.multi_reduction <add>, %23, %cst_16 [1] : vector<16x32xf32> to vector<16xf32>
    %25 = vector.shape_cast %24 : vector<16xf32> to vector<16x1xf32>
    %cst_17 = arith.constant 5.000000e-01 : f32
    %26 = vector.broadcast %cst_17 : f32 to vector<16x1xf32>
    %27 = arith.mulf %25, %26 : vector<16x1xf32>
    %28 = arith.truncf %7 : vector<16x32xf32> to vector<16x32xbf16>
    %c0_18 = arith.constant 0 : index
    %c0_19 = arith.constant 0 : index
    %29 = vector.load %arg8[%c0_18, %c0_19] : memref<32x128xbf16, #tpu.memory_space<vmem>>, vector<32x128xbf16>
    %cst_20 = arith.constant dense<0.000000e+00> : vector<16x128xf32>
    %30 = tpu.matmul %28, %29, %cst_20 {dimension_numbers = #tpu.dot_dimension_numbers<[1], [0], [0], [1], [0, 0, 1, 1], [], []>} : vector<16x32xbf16>, vector<32x128xbf16>, vector<16x128xf32> -> vector<16x128xf32>
    %31 = vector.broadcast %27 : vector<16x1xf32> to vector<16x128xf32>
    %32 = arith.subf %30, %31 : vector<16x128xf32>
    %33 = math.exp %32 : vector<16x128xf32>
    %cst_21 = arith.constant 2.500000e-01 : f32
    %34 = vector.broadcast %cst_21 : f32 to vector<16x128xf32>
    %35 = arith.mulf %33, %34 : vector<16x128xf32>
    %36 = vector.broadcast %22 : vector<1x128xf32> to vector<16x128xf32>
    %37 = arith.mulf %35, %36 : vector<16x128xf32>
    %38 = vector.shape_cast %37 : vector<16x128xf32> to vector<2x8x128xf32>
    %39 = arith.mulf %12, %12 : vector<16x32xf32>
    %cst_22 = arith.constant dense<0.000000e+00> : vector<16xf32>
    %40 = vector.multi_reduction <add>, %39, %cst_22 [1] : vector<16x32xf32> to vector<16xf32>
    %41 = vector.shape_cast %40 : vector<16xf32> to vector<16x1xf32>
    %cst_23 = arith.constant 5.000000e-01 : f32
    %42 = vector.broadcast %cst_23 : f32 to vector<16x1xf32>
    %43 = arith.mulf %41, %42 : vector<16x1xf32>
    %44 = arith.truncf %12 : vector<16x32xf32> to vector<16x32xbf16>
    %c0_24 = arith.constant 0 : index
    %c0_25 = arith.constant 0 : index
    %45 = vector.load %arg8[%c0_24, %c0_25] : memref<32x128xbf16, #tpu.memory_space<vmem>>, vector<32x128xbf16>
    %cst_26 = arith.constant dense<0.000000e+00> : vector<16x128xf32>
    %46 = tpu.matmul %44, %45, %cst_26 {dimension_numbers = #tpu.dot_dimension_numbers<[1], [0], [0], [1], [0, 0, 1, 1], [], []>} : vector<16x32xbf16>, vector<32x128xbf16>, vector<16x128xf32> -> vector<16x128xf32>
    %47 = vector.broadcast %43 : vector<16x1xf32> to vector<16x128xf32>
    %48 = arith.subf %46, %47 : vector<16x128xf32>
    %49 = math.exp %48 : vector<16x128xf32>
    %cst_27 = arith.constant 2.500000e-01 : f32
    %50 = vector.broadcast %cst_27 : f32 to vector<16x128xf32>
    %51 = arith.mulf %49, %50 : vector<16x128xf32>
    %52 = vector.broadcast %22 : vector<1x128xf32> to vector<16x128xf32>
    %53 = arith.mulf %51, %52 : vector<16x128xf32>
    %54 = vector.shape_cast %53 : vector<16x128xf32> to vector<2x8x128xf32>
    %55 = vector.shape_cast %17 : vector<16x32xf32> to vector<2x8x32xf32>
    %cst_28 = arith.constant dense<0.000000e+00> : vector<2x128xf32>
    %56 = vector.multi_reduction <add>, %38, %cst_28 [1] : vector<2x8x128xf32> to vector<2x128xf32>
    %57 = vector.shape_cast %56 : vector<2x128xf32> to vector<2x1x128xf32>
    %58 = vector.broadcast %57 : vector<2x1x128xf32> to vector<2x8x128xf32>
    %59 = arith.mulf %54, %58 : vector<2x8x128xf32>
    %cst_29 = arith.constant dense<0.000000e+00> : vector<2x8xf32>
    %60 = vector.multi_reduction <add>, %59, %cst_29 [2] : vector<2x8x128xf32> to vector<2x8xf32>
    %61 = vector.shape_cast %60 : vector<2x8xf32> to vector<2x8x1xf32>
    %62 = arith.truncf %55 : vector<2x8x32xf32> to vector<2x8x32xbf16>
    %63 = arith.truncf %38 : vector<2x8x128xf32> to vector<2x8x128xbf16>
    %cst_30 = arith.constant dense<0.000000e+00> : vector<2x32x128xf32>
    %64 = tpu.matmul %62, %63, %cst_30 {dimension_numbers = #tpu.dot_dimension_numbers<[1], [1], [2], [2], [0, 0, 0, 2, 1, 2], [0], [0]>} : vector<2x8x32xbf16>, vector<2x8x128xbf16>, vector<2x32x128xf32> -> vector<2x32x128xf32>
    %65 = arith.truncf %54 : vector<2x8x128xf32> to vector<2x8x128xbf16>
    %66 = arith.truncf %64 : vector<2x32x128xf32> to vector<2x32x128xbf16>
    %cst_31 = arith.constant dense<0.000000e+00> : vector<2x8x32xf32>
    %67 = tpu.matmul %65, %66, %cst_31 {dimension_numbers = #tpu.dot_dimension_numbers<[2], [2], [1], [1], [0, 0, 0, 1, 1, 1], [0], [0]>} : vector<2x8x128xbf16>, vector<2x32x128xbf16>, vector<2x8x32xf32> -> vector<2x8x32xf32>
    %cst_32 = arith.constant 9.99999993E-9 : f32
    %68 = vector.broadcast %cst_32 : f32 to vector<2x8x1xf32>
    %69 = arith.addf %61, %68 : vector<2x8x1xf32>
    %70 = tpu.reciprocal %69 {approx = true} : vector<2x8x1xf32> -> vector<2x8x1xf32>
    %71 = vector.broadcast %70 : vector<2x8x1xf32> to vector<2x8x32xf32>
    %72 = arith.mulf %67, %71 : vector<2x8x32xf32>
    %73 = vector.shape_cast %72 : vector<2x8x32xf32> to vector<16x32xf32>
    %74 = arith.truncf %73 : vector<16x32xf32> to vector<16x32xbf16>
    %c0_33 = arith.constant 0 : index
    %c0_34 = arith.constant 0 : index
    %75 = vector.load %arg9[%c0_33, %c0_34] : memref<32x32xbf16, #tpu.memory_space<vmem>>, vector<32x32xbf16>
    %cst_35 = arith.constant dense<0.000000e+00> : vector<16x32xf32>
    %76 = tpu.matmul %74, %75, %cst_35 {dimension_numbers = #tpu.dot_dimension_numbers<[1], [0], [0], [1], [0, 0, 1, 1], [], []>} : vector<16x32xbf16>, vector<32x32xbf16>, vector<16x32xf32> -> vector<16x32xf32>
    %c0_36 = arith.constant 0 : index
    %c0_37 = arith.constant 0 : index
    %77 = vector.load %arg10[%c0_36, %c0_37] : memref<1x32xf32, #tpu.memory_space<vmem>>, vector<1x32xf32>
    %78 = vector.broadcast %77 : vector<1x32xf32> to vector<16x32xf32>
    %79 = arith.addf %76, %78 : vector<16x32xf32>
    %80 = vector.shape_cast %79 : vector<16x32xf32> to vector<2x8x32xf32>
    %c0_38 = arith.constant 0 : index
    %c0_39 = arith.constant 0 : index
    %c0_40 = arith.constant 0 : index
    %81 = vector.load %arg11[%c0_38, %c0_39, %c0_40] : memref<2x8x32xf32, #tpu.memory_space<vmem>>, vector<2x8x32xf32>
    tpu.vector_store %arg11[%c0_38, %c0_39, %c0_40], %80 {strides = array<i32>} : memref<2x8x32xf32, #tpu.memory_space<vmem>>, vector<2x8x32xf32>,
    return
  }
  func.func @transform_0(%arg0: i32) -> (i32, i32, i32) {
    %c0_i32 = arith.constant 0 : i32
    %c0_i32_0 = arith.constant 0 : i32
    %c0_i32_1 = arith.constant 0 : i32
    return %arg0, %c0_i32, %c0_i32_0 : i32, i32, i32
  }
  func.func @transform_1(%arg0: i32) -> (i32, i32) {
    %c0_i32 = arith.constant 0 : i32
    %c0_i32_0 = arith.constant 0 : i32
    %c0_i32_1 = arith.constant 0 : i32
    return %c0_i32, %c0_i32_0 : i32, i32
  }
  func.func @transform_2(%arg0: i32) -> (i32, i32) {
    %c0_i32 = arith.constant 0 : i32
    %c0_i32_0 = arith.constant 0 : i32
    %c0_i32_1 = arith.constant 0 : i32
    return %c0_i32, %c0_i32_0 : i32, i32
  }
  func.func @transform_3(%arg0: i32) -> (i32, i32) {
    %c0_i32 = arith.constant 0 : i32
    %c0_i32_0 = arith.constant 0 : i32
    %c0_i32_1 = arith.constant 0 : i32
    return %c0_i32, %c0_i32_0 : i32, i32
  }
  func.func @transform_4(%arg0: i32) -> (i32, i32) {
    %c0_i32 = arith.constant 0 : i32
    %c0_i32_0 = arith.constant 0 : i32
    %c0_i32_1 = arith.constant 0 : i32
    return %c0_i32, %c0_i32_0 : i32, i32
  }
  func.func @transform_5(%arg0: i32) -> (i32, i32) {
    %c0_i32 = arith.constant 0 : i32
    %c0_i32_0 = arith.constant 0 : i32
    %c0_i32_1 = arith.constant 0 : i32
    return %c0_i32, %c0_i32_0 : i32, i32
  }
  func.func @transform_6(%arg0: i32) -> (i32, i32) {
    %c0_i32 = arith.constant 0 : i32
    %c0_i32_0 = arith.constant 0 : i32
    %c0_i32_1 = arith.constant 0 : i32
    return %c0_i32, %c0_i32_0 : i32, i32
  }
  func.func @transform_7(%arg0: i32) -> (i32, i32) {
    %c0_i32 = arith.constant 0 : i32
    %c0_i32_0 = arith.constant 0 : i32
    %c0_i32_1 = arith.constant 0 : i32
    return %c0_i32, %c0_i32_0 : i32, i32
  }
  func.func @transform_8(%arg0: i32) -> (i32, i32) {
    %c0_i32 = arith.constant 0 : i32
    %c0_i32_0 = arith.constant 0 : i32
    %c0_i32_1 = arith.constant 0 : i32
    return %c0_i32, %c0_i32_0 : i32, i32
  }
  func.func @transform_9(%arg0: i32) -> (i32, i32) {
    %c0_i32 = arith.constant 0 : i32
    %c0_i32_0 = arith.constant 0 : i32
    %c0_i32_1 = arith.constant 0 : i32
    return %c0_i32, %c0_i32_0 : i32, i32
  }
  func.func @transform_10(%arg0: i32) -> (i32, i32, i32) {
    %c0_i32 = arith.constant 0 : i32
    %c0_i32_0 = arith.constant 0 : i32
    %c0_i32_1 = arith.constant 0 : i32
    return %arg0, %c0_i32, %c0_i32_0 : i32, i32, i32
  }
}

</mosaic_0001>

<bundles_post_ra>
// kernel: tpu_custom_call.1
= control target key start
LH: loop header
LB: loop body
LE: loop exit
PB: predicated region body
PF: predicated region fallthrough
CT: control target
= control target key end

     0   :  { %15 = vsyncpa [#allocation3], 0  ;;  %s1340_s0 = inlined_call_operand.hbm [shape: f32[2,8,32], index: 0, kind: input, shape index: {}]   ;;  %s1341_s1 = inlined_call_operand.hbm [shape: bf16[32,32], index: 1, kind: input, shape index: {}]   ;;  %s1342_s2 = inlined_call_operand.hbm [shape: bf16[32,32], index: 2, kind: input, shape index: {}]   ;;  %s1343_s3 = inlined_call_operand.hbm [shape: bf16[32,32], index: 3, kind: input, shape index: {}]   ;;  %s1344_s4 = inlined_call_operand.vmem [shape: f32[1,32], index: 4, kind: input, shape index: {}]   ;;  %s1345_s5 = inlined_call_operand.vmem [shape: f32[1,32], index: 5, kind: input, shape index: {}]   ;;  %s1346_s6 = inlined_call_operand.vmem [shape: f32[1,32], index: 6, kind: input, shape index: {}]   ;;  %s1347_s7 = inlined_call_operand.vmem [shape: bf16[32,128], index: 7, kind: input, shape index: {}]   ;;  %s1348_s8 = inlined_call_operand.hbm [shape: bf16[32,32], index: 8, kind: input, shape index: {}]   ;;  %s1349_s9 = inlined_call_operand.vmem [shape: f32[1,32], index: 9, kind: input, shape index: {}]   ;;  %s1350_s10 = inlined_call_operand.hbm [shape: f32[2,8,32], index: 10, kind: output, shape index: {}]  }
   0x1   :  { %16 = vsyncpa [#allocation6], 0 }
   0x2   :  { %17 = vsyncpa [#allocation9], 0 }
   0x3   :  { %18 = vsyncpa [#allocation4], 0  ;;  %s1116_s13 = smov [#allocation5]   ;;  %s976_s17 = scalar_lea.hbm %s1341_s1, 256 }
   0x4   :  { %s36_s14 = sshll.u32 %s1116_s13, 4  ;;  %p977_p0 = scmp.ne.s32.totalorder %s1341_s1, %s976_s17  ;;  %s37_s14 = int_to_ptr.vmem [resolvable:$true] %s36_s14 }
   0x5   :  { %p980_p1 = scmp.lt.u32.totalorder %s976_s17, %s1341_s1 }
   0x7   :  { %p982_p2 = pnand %p980_p1, %p977_p0 }
   0x9   :  { %985 = shalt.err (!%p982_p2)
}
   0xa   :  { %s986_s22 = scalar_lea.vmem %s37_s14, 256  ;;  %p991_p4 = scmp.lt.s32.totalorder %s37_s14, %s37_s14 }
   0xb   :  { %p987_p3 = scmp.ne.s32.totalorder %s37_s14, %s986_s22  ;;  %p992_p5 = scmp.lt.s32.totalorder %s986_s22, %s986_s22 }
   0xd   :  { %p993_p6 = por %p992_p5, %p991_p4 }
   0xf   :  { %p994_p7 = pnand %p993_p6, %p987_p3 }
  0x11   :  { %997 = shalt.err (!%p994_p7)
}
  0x12   :  { %s1117_s23 = smov 64   ;;  %s1118_s24 = smov 4  }
  0x13   :  { %42 = dma.hbm_to_vmem [thread:$0]  %s1341_s1, 256, %s37_s14, [#allocation6], %s1117_s23, %s1117_s23, %s1118_s24  }
  0x14   :  { %s1119_s27 = smov [#allocation8]   ;;  %s1120_s29 = smov [#allocation2]  }
  0x15   :  { %s60_s28 = sshll.u32 %s1119_s27, 4  ;;  %s24_s30 = sshll.u32 %s1120_s29, 4  ;;  %s61_s28 = int_to_ptr.vmem [resolvable:$true] %s60_s28  ;;  %s25_s30 = int_to_ptr.vmem [resolvable:$true] %s24_s30 }
  0x16   :  { %s998_s13 = scalar_lea.hbm %s1343_s3, 256 }
  0x17   :  { %p999_p8 = scmp.ne.s32.totalorder %s1343_s3, %s998_s13  ;;  %p1002_p9 = scmp.lt.u32.totalorder %s998_s13, %s1343_s3 }
  0x19   :  { %p1004_p10 = pnand %p1002_p9, %p999_p8 }
  0x1b   :  { %1007 = shalt.err (!%p1004_p10)
}
  0x1c   :  { %s1008_s1 = scalar_lea.vmem %s61_s28, 256  ;;  %p1013_p12 = scmp.lt.s32.totalorder %s61_s28, %s61_s28 }
  0x1d   :  { %p1009_p11 = scmp.ne.s32.totalorder %s61_s28, %s1008_s1  ;;  %p1014_p13 = scmp.lt.s32.totalorder %s1008_s1, %s1008_s1 }
  0x1f   :  { %p1015_p0 = por %p1014_p13, %p1013_p12 }
  0x21   :  { %p1016_p1 = pnand %p1015_p0, %p1009_p11 }
  0x23   :  { %1019 = shalt.err (!%p1016_p1)
}
  0x24   :  { %66 = dma.hbm_to_vmem [thread:$0]  %s1343_s3, 256, %s61_s28, [#allocation9], %s1117_s23, %s1117_s23, %s1118_s24  }
  0x25   :  { %s1020_s22 = scalar_lea.hbm %s1340_s0, 256 }
  0x26   :  { %p1021_p2 = scmp.ne.s32.totalorder %s1340_s0, %s1020_s22  ;;  %p1024_p3 = scmp.lt.u32.totalorder %s1020_s22, %s1340_s0 }
  0x28   :  { %p1026_p4 = pnand %p1024_p3, %p1021_p2 }
  0x2a   :  { %1029 = shalt.err (!%p1026_p4)
}
  0x2b   :  { %s1030_s11 = scalar_lea.vmem %s25_s30, 256  ;;  %p1035_p6 = scmp.lt.s32.totalorder %s25_s30, %s25_s30 }
  0x2c   :  { %p1031_p5 = scmp.ne.s32.totalorder %s25_s30, %s1030_s11  ;;  %p1036_p7 = scmp.lt.s32.totalorder %s1030_s11, %s1030_s11 }
  0x2e   :  { %p1037_p8 = por %p1036_p7, %p1035_p6 }
  0x30   :  { %p1038_p9 = pnand %p1037_p8, %p1031_p5 }
  0x32   :  { %1041 = shalt.err (!%p1038_p9)
}
  0x33   :  { %s1121_s3 = smov 128   ;;  %s1122_s28 = smov 8  }
  0x34   :  { %30 = dma.hbm_to_vmem [thread:$0]  %s1340_s0, 256, %s25_s30, [#allocation3], %s1121_s3, %s1121_s3, %s1122_s28  }
  0x35   :  { %s1123_s15 = smov [#allocation7]   ;;  %s1124_s17 = smov [#allocation10]  }
  0x36   :  { %s48_s16 = sshll.u32 %s1123_s15, 4  ;;  %s80_s18 = sshll.u32 %s1124_s17, 4  ;;  %s49_s16 = int_to_ptr.vmem [resolvable:$true] %s48_s16  ;;  %s81_s18 = int_to_ptr.vmem [resolvable:$true] %s80_s18 }
  0x37   :  { %s1042_s19 = scalar_lea.hbm %s1342_s2, 256 }
  0x38   :  { %p1043_p10 = scmp.ne.s32.totalorder %s1342_s2, %s1042_s19  ;;  %p1046_p11 = scmp.lt.u32.totalorder %s1042_s19, %s1342_s2 }
  0x3a   :  { %p1048_p12 = pnand %p1046_p11, %p1043_p10 }
  0x3c   :  { %1051 = shalt.err (!%p1048_p12)
}
  0x3d   :  { %s1052_s0 = scalar_lea.vmem %s49_s16, 256  ;;  %p1057_p0 = scmp.lt.s32.totalorder %s49_s16, %s49_s16 }
  0x3e   :  { %p1053_p13 = scmp.ne.s32.totalorder %s49_s16, %s1052_s0  ;;  %p1058_p1 = scmp.lt.s32.totalorder %s1052_s0, %s1052_s0 }
  0x40   :  { %p1059_p2 = por %p1058_p1, %p1057_p0 }
  0x42   :  { %p1060_p3 = pnand %p1059_p2, %p1053_p13 }
  0x44   :  { %1063 = shalt.err (!%p1060_p3)
}
  0x45   :  { %54 = dma.hbm_to_vmem [thread:$0]  %s1342_s2, 256, %s49_s16, [#allocation6], %s1117_s23, %s1117_s23, %s1118_s24  }
  0x46   :  { %s1064_s11 = scalar_lea.hbm %s1348_s8, 256 }
  0x47   :  { %p1065_p4 = scmp.ne.s32.totalorder %s1348_s8, %s1064_s11  ;;  %p1068_p5 = scmp.lt.u32.totalorder %s1064_s11, %s1348_s8 }
  0x49   :  { %p1070_p6 = pnand %p1068_p5, %p1065_p4 }
  0x4b   :  { %1073 = shalt.err (!%p1070_p6)
}
  0x4c   :  { %s1074_s1 = scalar_lea.vmem %s81_s18, 256  ;;  %p1079_p8 = scmp.lt.s32.totalorder %s81_s18, %s81_s18 }
  0x4d   :  { %p1075_p7 = scmp.ne.s32.totalorder %s81_s18, %s1074_s1  ;;  %p1080_p9 = scmp.lt.s32.totalorder %s1074_s1, %s1074_s1 }
  0x4f   :  { %p1081_p10 = por %p1080_p9, %p1079_p8 }
  0x51   :  { %p1082_p11 = pnand %p1081_p10, %p1075_p7 }
  0x53   :  { %1085 = shalt.err (!%p1082_p11)
}
  0x54   :  { %86 = dma.hbm_to_vmem [thread:$0]  %s1348_s8, 256, %s81_s18, [#allocation9], %s1117_s23, %s1117_s23, %s1118_s24  }
  0x55   :  { %1108 = dma.done.wait [#allocation3], 256  }
  0x56   :  { %1109 = vsyncadd [#allocation3], 4294967040 }
  0x57   :  { %1110 = dma.done.wait [#allocation6], 512  }
  0x58   :  { %1111 = vsyncadd [#allocation6], 4294966784 }
  0x59   :  { %1112 = dma.done.wait [#allocation9], 512  }
  0x5a   :  { %1113 = vsyncadd [#allocation9], 4294966784  ;;  %v1125_v0 = vmov 0.0   ;;  %vm1126_vm0 = vmmov 0   ;;  %v954_v1 = vld [vmem:[#allocation5] sm:$0xff]   ;;  %v955_v2 = vld [vmem:[#allocation5 + $0x8] sm:$0xff]  }
  0x5b   :  { %863 = vmatprep.subr.bf16.mxu0 %v1125_v0  ;;  %867 = vmatprep.mubr.msk.bf16.mxu0 %vm1126_vm0, %v1125_v0  ;;  %v105_v3 = vld [vmem:[#allocation2] sm:$0xff]  ;;  %v106_v4 = vld [vmem:[#allocation2 + $0x8] sm:$0xff]  ;;  %vm131_vm1 = vcmask 261120   ;;  %v958_v8 = vld [vmem:[#allocation8] sm:$0xff]   ;;  %vm493_vm2 = vcmask 64512   ;;  %vm500_vm4 = vcmask 1043456  }
  0x5c   :  { %871 = vmatprep.subr.bf16.mxu1 %v1125_v0  ;;  %875 = vmatprep.mubr.msk.bf16.mxu1 %vm1126_vm0, %v1125_v0  ;;  %v956_v5 = vld [vmem:[#allocation7] sm:$0xff]   ;;  %v107_v6 = vpack.c.bf16 %v106_v4, %v105_v3  ;;  %v957_v7 = vld [vmem:[#allocation7 + $0x8] sm:$0xff]   ;;  %v959_v9 = vld [vmem:[#allocation8 + $0x8] sm:$0xff]   ;;  %s1127_s22 = smov [#allocation11]  }
  0x5d   :  { %864 = vmatpush3.bf16.msra.mxu0 %v954_v1  ;;  %872 = vmatpush3.bf16.msra.mxu1 %v956_v5  ;;  %v960_v10 = vld [vmem:[%s1347_s7] sm:$0xff]   ;;  %v961_v11 = vld [vmem:[%s1347_s7 + $0x8] sm:$0xff]   ;;  %s794_s25 = sshll.u32 %s1127_s22, 4  ;;  %s795_s25 = int_to_ptr.vmem [resolvable:$true] %s794_s25 }
  0x5e   :  { %865 = vmatprep.subr.bf16.mxu0 %v1125_v0  ;;  %873 = vmatprep.subr.bf16.mxu1 %v1125_v0  ;;  %v808_v12 = vld [vmem:[%s1344_s4] ss:$0 sm:$0xff]  ;;  %s1086_s0 = scalar_lea.vmem %s795_s25, 256  ;;  %p1091_p13 = scmp.lt.s32.totalorder %s795_s25, %s795_s25 }
  0x5f   :  { %v812_v16 = vld [vmem:[%s1345_s5] ss:$0 sm:$0xff]  ;;  %p1087_p12 = scmp.ne.s32.totalorder %s795_s25, %s1086_s0  ;;  %p1092_p0 = scmp.lt.s32.totalorder %s1086_s0, %s1086_s0 }
  0x60   :  { %v816_v29 = vld [vmem:[%s1346_s6] ss:$0 sm:$0xff] }
  0x61   :  { %866 = vmatpush3.bf16.msra.mxu0 %v955_v2  ;;  %874 = vmatpush3.bf16.msra.mxu1 %v957_v7  ;;  %v304_v2 = vlaneseq  ;;  %p1093_p1 = por %p1092_p0, %p1091_p13 }
  0x62   :  { %879 = vmatprep.subr.bf16.mxu0 %v1125_v0  ;;  %887 = vmatprep.subr.bf16.mxu1 %v1125_v0 }
  0x63   :  { %p1094_p2 = pnand %p1093_p1, %p1087_p12 }
  0x64   :  { %868 = vmatmul.mubr.msk.bf16.vlgmr.msra.gmra.mrb[0].mxu0 %vm131_vm1, %v107_v6  ;;  %876 = vmatmul.mubr.msk.bf16.vlgmr.msra.gmra.mrb[0].mxu1 %vm131_vm1, %v107_v6 }
  0x65   :  { %880 = vmatpush3.bf16.msra.mxu0 %v958_v8  ;;  %883 = vmatprep.mubr.msk.bf16.mxu0 %vm1126_vm0, %v1125_v0 }
  0x66   :  { %881 = vmatprep.subr.bf16.mxu0 %v1125_v0  ;;  %891 = vmatprep.mubr.msk.bf16.mxu1 %vm1126_vm0, %v1125_v0 }
  0x67   :  { %888 = vmatpush3.bf16.msra.mxu1 %v960_v10 }
  0x68   :  { %889 = vmatprep.subr.bf16.mxu1 %v1125_v0 }
  0x69   :  { %882 = vmatpush3.bf16.msra.mxu0 %v959_v9 }
  0x6a   :  { %895 = vmatprep.subr.bf16.mxu0 %v1125_v0 }
  0x6b   :  { %890 = vmatpush3.bf16.msra.mxu1 %v961_v11 }
  0x6c   :  { %884 = vmatmul.mubr.msk.bf16.vlgmr.msra.gmra.mrb[4].mxu0 %vm131_vm1, %v107_v6 }
  0x6d   :  { %899 = vmatprep.mubr.msk.bf16.mxu0 %vm1126_vm0, %v1125_v0  ;;  %896 = vmatpush3.bf16.msra.mxu0 %v960_v10  ;;  %v305_v10 = vand.u32 127, %v304_v2 }
  0x6e   :  { %897 = vmatprep.subr.bf16.mxu0 %v1125_v0 }
  0x6f   :  { %vm306_vm3 = vcmp.lt.s32.totalorder %v305_v10, 16 }
  0x71   :  { %898 = vmatpush3.bf16.msra.mxu0 %v961_v11 }
 0x137   :  { %v169_v13 = vpop.f32.mrb[0].mxu0  ;;  %v233_v21 = vpop.f32.mrb[0].mxu1 }
 0x138   :  { %v170_v14 = vadd.f32 %v808_v12, %v169_v13  ;;  %v869_v15 = vpop.f32.mrb[1].mxu0  ;;  %v234_v22 = vadd.f32 %v812_v16, %v233_v21  ;;  %v877_v23 = vpop.f32.mrb[1].mxu1  ;;  %v820_v13 = vsel %vm306_vm3, 1.0, %v1125_v0 }
 0x139   :  { %v172_v17 = vpop.f32.mrb[2].mxu0  ;;  %v236_v27 = vpop.f32.mrb[2].mxu1 }
 0x13a   :  { %v173_v18 = vadd.f32 %v808_v12, %v172_v17  ;;  %v870_v19 = vpop.f32.mrb[3].mxu0  ;;  %v309_v20 = vmul.f32 %v170_v14, %v170_v14  ;;  %v237_v28 = vadd.f32 %v812_v16, %v236_v27  ;;  %v878_v30 = vpop.f32.mrb[3].mxu1  ;;  %v390_v31 = vmul.f32 %v234_v22, %v234_v22 }
 0x13c   :  { %v319_v24 = vpack.c.bf16 %v173_v18, %v170_v14  ;;  %v311_v25 = vsel %vm131_vm1, %v309_v20, 0.0  ;;  %v310_v26 = vmul.f32 %v173_v18, %v173_v18  ;;  %v400_v32 = vpack.c.bf16 %v237_v28, %v234_v22 }
 0x13d   :  { %312 = vadd.xlane.f32.xlu0 %v311_v25  ;;  %v392_v40 = vsel %vm131_vm1, %v390_v31, 0.0  ;;  %v391_v43 = vmul.f32 %v237_v28, %v237_v28 }
 0x13e   :  { %892 = vmatmul.mubr.msk.bf16.vlgmr.msra.gmra.mrb[4].mxu1 %vm131_vm1, %v319_v24  ;;  %v314_v34 = vsel %vm131_vm1, %v310_v26, 0.0  ;;  %900 = vmatmul.mubr.msk.bf16.vlgmr.msra.gmra.mrb[8].mxu0 %vm131_vm1, %v400_v32 }
 0x13f   :  { %v297_v33 = vpop.f32.mrb[4].mxu0  ;;  %v395_v44 = vsel %vm131_vm1, %v391_v43, 0.0 }
 0x140   :  { %v885_v35 = vpop.f32.mrb[5].mxu0  ;;  %v298_v36 = vadd.f32 %v816_v29, %v297_v33 }
 0x141   :  { %315 = vadd.xlane.f32.xlu0 %v314_v34  ;;  %v300_v37 = vpop.f32.mrb[6].mxu0 }
 0x142   :  { %v473_v38 = vpack.c.bf16 %v298_v36, %v298_v36  ;;  %v301_v39 = vadd.f32 %v816_v29, %v300_v37  ;;  %v886_v41 = vpop.f32.mrb[7].mxu0 }
 0x144   :  { %477 = vxpose.xlu1.c.b16.start.end [1/1] (short) (narrow) %v473_v38, 32  ;;  %v474_v42 = vpack.c.bf16 %v301_v39, %v301_v39 }
 0x145   :  { %393 = vadd.xlane.f32.xlu0 %v392_v40 }
 0x149   :  { %553 = vxpose.xlu1.c.b16.start.end [1/1] (short) (narrow) %v474_v42, 32 }
 0x15a   :  { %396 = vadd.xlane.f32.xlu1 %v395_v44 }
 0x1aa   :  { %v485_v45 = vpop.trf.xlu1 }
 0x1ab   :  { %905 = vmatprep.mubr.msk.bf16.mxu1 %vm493_vm2, %v485_v45 }
 0x1ae   :  { %v486_v46 = vpop.trf.xlu1 }
 0x1b2   :  { %v561_v47 = vpop.trf.xlu1 }
 0x1b3   :  { %911 = vmatprep.mubr.msk.bf16.mxu0 %vm493_vm2, %v561_v47 }
 0x1b6   :  { %v562_v50 = vpop.trf.xlu1 }
 0x1ca   :  { %v313_v48 = vpop.xlane.xlu0 %312 }
 0x1cb   :  { %v317_v52 = vmul.f32 0.5, %v313_v48 }
 0x1ce   :  { %v316_v49 = vpop.xlane.xlu0 %315 }
 0x1cf   :  { %v318_v56 = vmul.f32 0.5, %v316_v49 }
 0x1d2   :  { %v394_v51 = vpop.xlane.xlu0 %393 }
 0x1d3   :  { %v398_v55 = vmul.f32 0.5, %v394_v51 }
 0x1e7   :  { %v397_v53 = vpop.xlane.xlu1 %396 }
 0x1e8   :  { %v399_v60 = vmul.f32 0.5, %v397_v53 }
 0x211   :  { %v373_v54 = vpop.f32.mrb[4].mxu1  ;;  %v438_v1 = vpop.f32.mrb[8].mxu0 }
 0x212   :  { %v380_v57 = vsub.f32 %v373_v54, %v317_v52  ;;  %v893_v58 = vpop.f32.mrb[5].mxu1  ;;  %v445_v3 = vsub.f32 %v438_v1, %v398_v55  ;;  %v901_v4 = vpop.f32.mrb[9].mxu0 }
 0x213   :  { %v376_v59 = vpop.f32.mrb[6].mxu1  ;;  %v441_v6 = vpop.f32.mrb[10].mxu0  ;;  %v963_v58 = vld [vmem:[#allocation10 + $0x8] sm:$0xff]  }
 0x214   :  { %v382_v61 = vmul.f32 1.442695, %v380_v57  ;;  %v381_v62 = vsub.f32 %v376_v59, %v318_v56  ;;  %v894_v63 = vpop.f32.mrb[7].mxu1  ;;  %v446_v7 = vsub.f32 %v441_v6, %v399_v60  ;;  %v902_v8 = vpop.f32.mrb[11].mxu0  ;;  %v447_v9 = vmul.f32 1.442695, %v445_v3 }
 0x215   :  { %v962_v57 = vld [vmem:[#allocation10] sm:$0xff]  }
 0x216   :  { %964 = vpow2.f32 %v382_v61  ;;  %v384_v5 = vmul.f32 1.442695, %v381_v62  ;;  %v449_v11 = vmul.f32 1.442695, %v446_v7 }
 0x218   :  { %966 = vpow2.f32 %v384_v5 }
 0x219   :  { %968 = vpow2.f32 %v447_v9 }
 0x21a   :  { %970 = vpow2.f32 %v449_v11 }
 0x220   :  { %v965_v12 = vpop.eup %964 }
 0x221   :  { %v386_v14 = vmul.f32 0.25, %v965_v12  ;;  %v829_v12 = vld [vmem:[%s1349_s9] ss:$0 sm:$0xff] }
 0x222   :  { %v967_v15 = vpop.eup %966 }
 0x223   :  { %v388_v16 = vmul.f32 %v820_v13, %v386_v14  ;;  %v387_v17 = vmul.f32 0.25, %v967_v15  ;;  %v969_v21 = vpop.eup %968 }
 0x224   :  { %v971_v26 = vpop.eup %970  ;;  %v451_v27 = vmul.f32 0.25, %v969_v21 }
 0x225   :  { %v389_v18 = vmul.f32 %v820_v13, %v387_v17  ;;  %v475_v19 = vpack.c.bf16 %v388_v16, %v388_v16  ;;  %v455_v20 = vrot.slane %v388_v16, 4  ;;  %v452_v31 = vmul.f32 0.25, %v971_v26 }
 0x226   :  { %v453_v34 = vmul.f32 %v820_v13, %v451_v27 }
 0x227   :  { %939 = vmatprep.subr.msk.bf16.mxu1 %vm500_vm4, %v475_v19  ;;  %v502_v22 = vsel %vm500_vm4, %v475_v19, 0  ;;  %v476_v23 = vpack.c.bf16 %v389_v18, %v389_v18  ;;  %v456_v24 = vadd.f32 %v455_v20, %v388_v16  ;;  %v461_v25 = vrot.slane %v389_v18, 4 }
 0x228   :  { %904 = vmatpush3.bf16.msra.mxu1 %v502_v22  ;;  %v454_v38 = vmul.f32 %v820_v13, %v452_v31  ;;  %v627_v55 = vpack.c.bf16 %v453_v34, %v453_v34 }
 0x229   :  { %940 = vmatprep.subr.msk.bf16.mxu0 %vm500_vm4, %v476_v23  ;;  %v576_v28 = vsel %vm500_vm4, %v476_v23, 0  ;;  %v457_v29 = vrot.slane %v456_v24, 2  ;;  %v462_v30 = vadd.f32 %v461_v25, %v389_v18  ;;  %915 = vmatprep.subr.bf16.mxu1 %v1125_v0 }
 0x22a   :  { %910 = vmatpush3.bf16.msra.mxu0 %v576_v28  ;;  %v628_v56 = vpack.c.bf16 %v454_v38, %v454_v38 }
 0x22b   :  { %906 = vmatmul.mubr.msk.bf16.vlgmr.msra.gmra.mrb[8].mxu1 %vm493_vm2, %v486_v46  ;;  %v458_v32 = vadd.f32 %v457_v29, %v456_v24  ;;  %v463_v33 = vrot.slane %v462_v30, 2  ;;  %923 = vmatprep.subr.bf16.mxu0 %v1125_v0 }
 0x22c   :  { %919 = vmatprep.mubr.msk.bf16.mxu1 %vm1126_vm0, %v1125_v0 }
 0x22d   :  { %912 = vmatmul.mubr.msk.bf16.vlgmr.msra.gmra.mrb[12].mxu0 %vm493_vm2, %v562_v50  ;;  %v459_v35 = vrot.slane %v458_v32, 1  ;;  %v464_v36 = vadd.f32 %v463_v33, %v462_v30 }
 0x22e   :  { %927 = vmatprep.mubr.msk.bf16.mxu0 %vm1126_vm0, %v1125_v0 }
 0x22f   :  { %v460_v37 = vadd.f32 %v459_v35, %v458_v32  ;;  %v465_v39 = vrot.slane %v464_v36, 1 }
 0x231   :  { %v467_v40 = vmul.f32 %v460_v37, %v453_v34  ;;  %v466_v41 = vadd.f32 %v465_v39, %v464_v36 }
 0x233   :  { %469 = vadd.xlane.f32.xlu0 %v467_v40  ;;  %v468_v42 = vmul.f32 %v466_v41, %v454_v38 }
 0x237   :  { %471 = vadd.xlane.f32.xlu0 %v468_v42 }
 0x2c0   :  { %v470_v59 = vpop.xlane.xlu0 %469 }
 0x2c1   :  { %v713_v61 = vadd.f32 1e-08, %v470_v59 }
 0x2c3   :  { %972 = vrcp.f32 %v713_v61 }
 0x2c4   :  { %v472_v60 = vpop.xlane.xlu0 %471 }
 0x2c5   :  { %v714_v62 = vadd.f32 1e-08, %v472_v60 }
 0x2c7   :  { %974 = vrcp.f32 %v714_v62 }
 0x2cd   :  { %v973_v1 = vpop.eup %972 }
 0x2d1   :  { %v975_v3 = vpop.eup %974 }
 0x2fe   :  { %v907_v43 = vpop.f32.mrb[8].mxu1 }
 0x2ff   :  { %v538_v44 = vpop.f32.mrb[9].mxu1 }
 0x300   :  { %v908_v45 = vpop.f32.mrb[10].mxu1  ;;  %v913_v46 = vpop.f32.mrb[12].mxu0 }
 0x301   :  { %v630_v47 = vpack.c.bf16 %v908_v45, %v907_v43  ;;  %v541_v48 = vpop.f32.mrb[11].mxu1  ;;  %v612_v49 = vpop.f32.mrb[13].mxu0 }
 0x302   :  { %v629_v50 = vpack.c.bf16 %v541_v48, %v538_v44  ;;  %v914_v51 = vpop.f32.mrb[14].mxu0 }
 0x303   :  { %v632_v52 = vpack.c.bf16 %v914_v51, %v913_v46  ;;  %v615_v53 = vpop.f32.mrb[15].mxu0 }
 0x304   :  { %v631_v54 = vpack.c.bf16 %v615_v53, %v612_v49  ;;  %916 = vmatpush3.bf16.xpose.msra.mxu1 %v629_v50 }
 0x305   :  { %917 = vmatprep.subr.bf16.mxu1 %v1125_v0 }
 0x306   :  { %924 = vmatpush3.bf16.xpose.msra.mxu0 %v631_v54 }
 0x307   :  { %925 = vmatprep.subr.bf16.mxu0 %v1125_v0 }
 0x30c   :  { %918 = vmatpush3.bf16.xpose.msra.mxu1 %v630_v47 }
 0x30d   :  { %931 = vmatprep.subr.bf16.mxu1 %v1125_v0 }
 0x30e   :  { %926 = vmatpush3.bf16.xpose.msra.mxu0 %v632_v52 }
 0x313   :  { %920 = vmatmul.mubr.bf16.vlgmr.msra.gmra.mrb[12].mxu1 %v627_v55 }
 0x314   :  { %935 = vmatprep.mubr.msk.bf16.mxu1 %vm1126_vm0, %v1125_v0  ;;  %932 = vmatpush3.bf16.msra.mxu1 %v962_v57 }
 0x315   :  { %928 = vmatmul.mubr.bf16.vlgmr.msra.gmra.mrb[16].mxu0 %v628_v56  ;;  %933 = vmatprep.subr.bf16.mxu1 %v1125_v0 }
 0x318   :  { %934 = vmatpush3.bf16.msra.mxu1 %v963_v58 }
 0x3e6   :  { %v667_v63 = vpop.f32.mrb[12].mxu1 }
 0x3e7   :  { %v921_v2 = vpop.f32.mrb[13].mxu1  ;;  %v717_v6 = vmul.f32 %v973_v1, %v667_v63 }
 0x3e8   :  { %v670_v4 = vpop.f32.mrb[14].mxu1  ;;  %v707_v5 = vpop.f32.mrb[16].mxu0 }
 0x3e9   :  { %v718_v7 = vmul.f32 %v975_v3, %v707_v5  ;;  %v922_v8 = vpop.f32.mrb[15].mxu1  ;;  %v929_v9 = vpop.f32.mrb[17].mxu0 }
 0x3ea   :  { %v710_v10 = vpop.f32.mrb[18].mxu0 }
 0x3eb   :  { %v719_v0 = vpack.c.bf16 %v718_v7, %v717_v6  ;;  %v930_v11 = vpop.f32.mrb[19].mxu0 }
 0x3ed   :  { %936 = vmatmul.mubr.msk.bf16.vlgmr.msra.gmra.mrb[16].mxu1 %vm131_vm1, %v719_v0 }
 0x4c0   :  { %v780_v13 = vpop.f32.mrb[16].mxu1 }
 0x4c1   :  { %v781_v14 = vadd.f32 %v829_v12, %v780_v13  ;;  %v937_v15 = vpop.f32.mrb[17].mxu1 }
 0x4c2   :  { %v783_v16 = vpop.f32.mrb[18].mxu1 }
 0x4c3   :  { %787 = vst.msk [vmem:[#allocation11] sm:$0xff] %vm131_vm1, %v781_v14  ;;  %v784_v17 = vadd.f32 %v829_v12, %v783_v16  ;;  %v938_v18 = vpop.f32.mrb[19].mxu1 }
 0x4c5   :  { %788 = vst.msk [vmem:[#allocation11 + $0x8] sm:$0xff] %vm131_vm1, %v784_v17 }
 0x4c6   :  { %1097 = shalt.err (!%p1094_p2)
}
 0x4c7   :  { %s1098_s26 = scalar_lea.hbm %s1350_s10, 256 }
 0x4c8   :  { %p1099_p3 = scmp.ne.s32.totalorder %s1350_s10, %s1098_s26  ;;  %p1102_p4 = scmp.lt.u32.totalorder %s1098_s26, %s1350_s10 }
 0x4ca   :  { %p1104_p5 = pnand %p1102_p4, %p1099_p3 }
 0x4cc   :  { %1107 = shalt.err (!%p1104_p5)
}
 0x4cd   :  { %800 = dma.vmem_to_hbm [thread:$0]  %s795_s25, 256, %s1350_s10, [#allocation4], %s1121_s3, %s1121_s3, %s1122_s28  }
 0x4ce   :  { %1114 = dma.done.wait [#allocation4], 256  }
 0x4cf   :  { %1115 = vsyncadd [#allocation4], 4294967040 }
 0x4d0   :  { %804 = vsyncpa [#allocation3], 1 }
 0x4d1   :  { %805 = vsyncpa [#allocation6], 1 }
 0x4d2   :  { %806 = vsyncpa [#allocation9], 1 }
 0x4d3   :  { %807 = vsyncpa [#allocation4], 1 }

</bundles_post_ra>
